<compile_context>
chip_gen: v5e
topology: v5e:2x2
jax: 0.10.0
libtpu: 0.0.40
codegen_flags: <defaults>
</compile_context>

<pallas_src>
import jax
import jax.numpy as jnp
from jax.experimental import pallas as pl
from jax.experimental.pallas import tpu as pltpu

SMALL_BATCH_THRESHOLD = 512  # below this, plain XLA is strictly faster
MAX_TILE_B = 2048            # <4 MiB/tile even double-buffered; fine on all gens


def _round_up(v, m):
    return ((v + m - 1) // m) * m


def linear_kernel(x_ref, w_ref, b_ref, o_ref):
    # x_ref: (TILE_B, IN)  w_ref: (IN, OUT)  b_ref: (1, OUT)  o_ref: (TILE_B, OUT)
    acc = jnp.dot(x_ref[...], w_ref[...], preferred_element_type=jnp.float32)
    o_ref[...] = (acc + b_ref[...].astype(jnp.float32)).astype(o_ref.dtype)


def prepare_params(weight, bias):
    """One-time param prep (init path): (OUT, IN) -> (IN, OUT), (OUT,) -> (1, OUT)."""
    w_t = jnp.asarray(weight).T                     # (IN, OUT)
    b_row = jnp.asarray(bias).reshape(1, -1)        # (1, OUT)
    return w_t, b_row


def linear_forward(x, w_t, b_row):
    """x: (B, IN); w_t: (IN, OUT); b_row: (1, OUT). Returns (B, OUT)."""
    batch, in_features = x.shape
    out_features = w_t.shape[1]

    # Small-batch fast path: pallas_call fixed cost dominates tiny workloads.
    if batch < SMALL_BATCH_THRESHOLD:
        return x @ w_t + b_row

    # Batch tile: large (amortizes per-step overhead) but guarantees >=2 grid
    # steps so both v7x TensorCores are used for mid-size batches.
    tile_b = min(MAX_TILE_B, _round_up(pl.cdiv(batch, 2), 8))
    grid = (pl.cdiv(batch, tile_b),)

    cost = pl.CostEstimate(
        flops=2 * batch * in_features * out_features,
        transcendentals=0,
        bytes_accessed=4 * (batch * in_features
                            + batch * out_features
                            + in_features * out_features
                            + out_features),
    )

    out = pl.pallas_call(
        linear_kernel,
        out_shape=jax.ShapeDtypeStruct((batch, out_features), x.dtype),
        grid=grid,
        in_specs=[
            pl.BlockSpec((tile_b, in_features), lambda i: (i, 0)),        # batch-tiled x
            pl.BlockSpec((in_features, out_features), lambda i: (0, 0)),  # resident W^T
            pl.BlockSpec((1, out_features), lambda i: (0, 0)),            # resident bias
        ],
        out_specs=pl.BlockSpec((tile_b, out_features), lambda i: (i, 0)),
        compiler_params=pltpu.CompilerParams(
            dimension_semantics=("parallel",),   # shard batch across TCs (v7x)
        ),
        cost_estimate=cost,
    )(x, w_t, b_row)

    return out


if __name__ == "__main__":
    input_size = 5
    output_size = 2

    key = jax.random.PRNGKey(0)
    k_x1, k_x2, k_w, k_b = jax.random.split(key, 4)

    # Deterministic parameter init (mimicking nn.Linear's uniform bound 1/sqrt(fan_in))
    bound = 1.0 / jnp.sqrt(jnp.float32(input_size))
    weight = jax.random.uniform(k_w, (output_size, input_size),
                                dtype=jnp.float32, minval=-bound, maxval=bound)
    bias = jax.random.uniform(k_b, (output_size,),
                              dtype=jnp.float32, minval=-bound, maxval=bound)

    # Param prep happens once (init/param-loading path), not per forward call.
    w_t, b_row = prepare_params(weight, bias)

    # Case 1: tiny batch (fast path, matches the original test's shape).
    x_small = jax.random.normal(k_x1, (8, input_size), dtype=jnp.float32)
    out_small = jax.block_until_ready(linear_forward(x_small, w_t, b_row))
    ref_small = x_small @ weight.T + bias
    assert out_small.shape == (8, output_size)
    assert jnp.allclose(out_small, ref_small, atol=1e-5, rtol=1e-5), "small-batch mismatch"
    print('  In Model: input size', tuple(x_small.shape), 'output size', tuple(out_small.shape))

    # Case 2: larger, ragged batch -> exercises the Pallas kernel (2 grid steps,
    # partial tail block handled by Pallas write-masking).
    x_large = jax.random.normal(k_x2, (1000, input_size), dtype=jnp.float32)
    out_large = jax.block_until_ready(linear_forward(x_large, w_t, b_row))
    ref_large = x_large @ weight.T + bias
    assert out_large.shape == (1000, output_size)
    assert jnp.allclose(out_large, ref_large, atol=1e-5, rtol=1e-5), "pallas mismatch"
    print('  In Model: input size', tuple(x_large.shape), 'output size', tuple(out_large.shape))

    print("KERNEL_OK")
</pallas_src>

<mosaic_0001>
module attributes {stable_mosaic.version = 11 : i64} {
  func.func @linear_kernel(%arg0: i32, %arg1: memref<504x5xf32, #tpu.memory_space<vmem>>, %arg2: memref<5x2xf32, #tpu.memory_space<vmem>>, %arg3: memref<1x2xf32, #tpu.memory_space<vmem>>, %arg4: memref<504x2xf32, #tpu.memory_space<vmem>>) attributes {dimension_semantics = [#tpu.dimension_semantics<parallel>], iteration_bounds = array<i64: 2>, scalar_prefetch = 0 : i64, scratch_operands = 0 : i64, tpu.core_type = #tpu.core_type<tc>, window_params = [{transform_indices = @transform_0, window_bounds = array<i64: 504, 5>}, {pipeline_mode = #tpu.pipeline_mode<synchronous>, transform_indices = @transform_1, window_bounds = array<i64: 5, 2>}, {pipeline_mode = #tpu.pipeline_mode<synchronous>, transform_indices = @transform_2, window_bounds = array<i64: 1, 2>}, {transform_indices = @transform_3, window_bounds = array<i64: 504, 2>}]} {
    %c0 = arith.constant 0 : index
    %c0_0 = arith.constant 0 : index
    %0 = vector.load %arg1[%c0, %c0_0] : memref<504x5xf32, #tpu.memory_space<vmem>>, vector<504x5xf32>
    %c0_1 = arith.constant 0 : index
    %c0_2 = arith.constant 0 : index
    %1 = vector.load %arg2[%c0_1, %c0_2] : memref<5x2xf32, #tpu.memory_space<vmem>>, vector<5x2xf32>
    %cst = arith.constant dense<0.000000e+00> : vector<504x2xf32>
    %2 = tpu.matmul %0, %1, %cst {dimension_numbers = #tpu.dot_dimension_numbers<[1], [0], [0], [1], [0, 0, 1, 1], [], []>} : vector<504x5xf32>, vector<5x2xf32>, vector<504x2xf32> -> vector<504x2xf32>
    %c0_3 = arith.constant 0 : index
    %c0_4 = arith.constant 0 : index
    %3 = vector.load %arg3[%c0_3, %c0_4] : memref<1x2xf32, #tpu.memory_space<vmem>>, vector<1x2xf32>
    %4 = vector.broadcast %3 : vector<1x2xf32> to vector<504x2xf32>
    %5 = arith.addf %2, %4 : vector<504x2xf32>
    %c0_5 = arith.constant 0 : index
    %c0_6 = arith.constant 0 : index
    %6 = vector.load %arg4[%c0_5, %c0_6] : memref<504x2xf32, #tpu.memory_space<vmem>>, vector<504x2xf32>
    tpu.vector_store %arg4[%c0_5, %c0_6], %5 {strides = array<i32>} : memref<504x2xf32, #tpu.memory_space<vmem>>, vector<504x2xf32>,
    return
  }
  func.func @transform_0(%arg0: i32) -> (i32, i32) {
    %c0_i32 = arith.constant 0 : i32
    %c0_i32_0 = arith.constant 0 : i32
    return %arg0, %c0_i32 : i32, i32
  }
  func.func @transform_1(%arg0: i32) -> (i32, i32) {
    %c0_i32 = arith.constant 0 : i32
    %c0_i32_0 = arith.constant 0 : i32
    %c0_i32_1 = arith.constant 0 : i32
    return %c0_i32, %c0_i32_0 : i32, i32
  }
  func.func @transform_2(%arg0: i32) -> (i32, i32) {
    %c0_i32 = arith.constant 0 : i32
    %c0_i32_0 = arith.constant 0 : i32
    %c0_i32_1 = arith.constant 0 : i32
    return %c0_i32, %c0_i32_0 : i32, i32
  }
  func.func @transform_3(%arg0: i32) -> (i32, i32) {
    %c0_i32 = arith.constant 0 : i32
    %c0_i32_0 = arith.constant 0 : i32
    return %arg0, %c0_i32 : i32, i32
  }
}

</mosaic_0001>

<bundles_post_ra>
// kernel: tpu_custom_call.1
= control target key start
LH: loop header
LB: loop body
LE: loop exit
PB: predicated region body
PF: predicated region fallthrough
CT: control target
= control target key end

     0   :  { %s1352_s12 = smov 0   ;;  %s1354_s13 = smov 0   ;;  %s1859_s0 = inlined_call_operand.vmem [shape: f32[1000,5], index: 0, kind: input, shape index: {}]   ;;  %s1860_s1 = inlined_call_operand.vmem [shape: f32[5,2], index: 1, kind: input, shape index: {}]   ;;  %s1861_s2 = inlined_call_operand.vmem [shape: f32[1,2], index: 2, kind: input, shape index: {}]   ;;  %s1862_s3 = inlined_call_operand.vmem [shape: f32[1000,2], index: 3, kind: output, shape index: {}]  }
   0x1   :  { %s1356_s14 = smov 0  }
   0x2 LB: > { %s1365_s15 = sadd.s32 4294967295, %s1298_s14   ;;  %s1367_s16 = sadd.s32 1, %s1298_s14   ;;  %s1298_s14 = sphi %s1356_s14, %s1871_s14   ;;  %s1294_s13 = sphi %s1354_s13, %s1870_s13   ;;  %s1290_s12 = sphi %s1352_s12, %s1869_s12  }
   0x3   : > { %s85_s17 = ssub.s32 %s1298_s14, %s1367_s16  ;;  %s88_s18 = sadd.s32 1, %s1294_s13 }
   0x4   : > { %p86_p0 = scmp.eq.s32.totalorder %s85_s17, 0  ;;  %p98_p1 = scmp.ne.s32.totalorder %s1294_s13, %s1290_s12 }
   0x5   : > { %p99_p2 = scmp.eq.s32.totalorder %s1365_s15, 1  ;;  %p1067_p3 = scmp.ge.s32.totalorder %s1298_s14, 1 }
   0x6   : > { %s1375_s19 = scalar_select %p86_p0, %s1294_s13, %s88_s18  }
   0x7   : > { %p1377_p4 = por %p99_p2, %p98_p1  ;;  %p146_p5 = scmp.lt.s32.totalorder %s1298_s14, 3 }
   0x9   : > { %p147_p6 = pnand %p1067_p3, %p146_p5 }
   0xa   : > { %s1385_s23 = smul.u32 (!%p147_p6), 63, %s1365_s15  ;;  %s170_s29 = sand.u32 (!%p147_p6), 1, %s1290_s12  }
   0xb   : > { %150 = sbr.rel (%p147_p6) target bundleno = 340 (0x154), region = 32 }
   0xc   : > { %p178_p7 = scmp.lt.s32.totalorder (!%p147_p6), %s1385_s23, 124  ;;  %s1154_s30 = smul.u32 (!%p147_p6), 504, %s170_s29 }
   0xe   : > { %s1528_s6 = scalar_lea.vmem (!%p147_p6), [#allocation2], %s1154_s30  }
  0x10   : > { %v255_v0 = vld [vmem:[%s1860_s1] sm:$0x1f]  ;;  %vm450_vm0 = vcmask 1044480   ;;  %s179_s24 = scalar_select %p178_p7, %s1385_s23, 124  ;;  %vm260_vm1 = vcmask 39936   ;;  %vm660_vm2 = vcmask 15360  }
  0x11   : > { %1152 = vmatpush.msk.msra.mxu2 %vm450_vm0, %v255_v0  ;;  %1069 = vmatpush.msk.msra.mxu0 %vm450_vm0, %v255_v0  ;;  %s732_s7 = ssub.s32 (%p1377_p4), 125, %s1385_s23  ;;  %s1148_s8 = smul.u32 (%p1377_p4), 504, %s1365_s15 }
  0x12   : > { %1151 = vmatpush.msk.msra.mxu1 %vm450_vm0, %v255_v0  ;;  %1153 = vmatpush.msk.msra.mxu3 %vm450_vm0, %v255_v0  ;;  %s1068_s25 = sshll.u32 %s179_s24, 3  ;;  %v1524_v0 = vld [vmem:[%s1861_s2] ss:$0 sm:$0xff]  ;;  %p733_p8 = scmp.lt.s32.totalorder (%p1377_p4), %s732_s7, 63 }
  0x13   : > { %s1392_s28 = scalar_lea.vmem %s1859_s0, %s1068_s25  ;;  %s1724_s11 = scalar_lea.vmem (%p1377_p4), %s1862_s3, %s1148_s8  }
  0x14   : > { %v224_v1 = vld [vmem:[%s1392_s28 + $0x100] sm:$0xff]  ;;  %v225_v5 = vld [vmem:[%s1392_s28 + $0x108] sm:$0xff]  ;;  %v226_v9 = vld [vmem:[%s1392_s28 + $0x110] sm:$0xff] }
  0x15   : > { %v192_v2 = vld [vmem:[%s1392_s28] sm:$0xff]  ;;  %1102 = vmatmul.msk.f32.vlgmr.msra.gmra.mxu2 %vm260_vm1, %v224_v1  ;;  %v193_v6 = vld [vmem:[%s1392_s28 + $0x8] sm:$0xff]  ;;  %v194_v10 = vld [vmem:[%s1392_s28 + $0x10] sm:$0xff] }
  0x16   : > { %v208_v3 = vld [vmem:[%s1392_s28 + $0x80] sm:$0xff]  ;;  %1070 = vmatmul.msk.f32.vlgmr.msra.gmra.mxu0 %vm260_vm1, %v192_v2  ;;  %v209_v7 = vld [vmem:[%s1392_s28 + $0x88] sm:$0xff]  ;;  %v210_v11 = vld [vmem:[%s1392_s28 + $0x90] sm:$0xff] }
  0x17   : > { %v240_v4 = vld [vmem:[%s1392_s28 + $0x180] sm:$0xff]  ;;  %1086 = vmatmul.msk.f32.vlgmr.msra.gmra.mxu1 %vm260_vm1, %v208_v3  ;;  %v241_v8 = vld [vmem:[%s1392_s28 + $0x188] sm:$0xff]  ;;  %v242_v12 = vld [vmem:[%s1392_s28 + $0x190] sm:$0xff] }
  0x18   : > { %1118 = vmatmul.msk.f32.vlgmr.msra.gmra.mxu3 %vm260_vm1, %v240_v4  ;;  %v227_v13 = vld [vmem:[%s1392_s28 + $0x118] sm:$0xff]  ;;  %v228_v17 = vld [vmem:[%s1392_s28 + $0x120] sm:$0xff]  ;;  %v229_v21 = vld [vmem:[%s1392_s28 + $0x128] sm:$0xff] }
  0x19   : > { %v195_v14 = vld [vmem:[%s1392_s28 + $0x18] sm:$0xff]  ;;  %v196_v18 = vld [vmem:[%s1392_s28 + $0x20] sm:$0xff]  ;;  %v197_v22 = vld [vmem:[%s1392_s28 + $0x28] sm:$0xff] }
  0x1a   : > { %v211_v15 = vld [vmem:[%s1392_s28 + $0x98] sm:$0xff]  ;;  %v212_v19 = vld [vmem:[%s1392_s28 + $0xa0] sm:$0xff]  ;;  %v213_v23 = vld [vmem:[%s1392_s28 + $0xa8] sm:$0xff] }
  0x1b   : > { %v243_v16 = vld [vmem:[%s1392_s28 + $0x198] sm:$0xff]  ;;  %v244_v20 = vld [vmem:[%s1392_s28 + $0x1a0] sm:$0xff]  ;;  %v245_v24 = vld [vmem:[%s1392_s28 + $0x1a8] sm:$0xff] }
  0x1c   : > { %v230_v25 = vld [vmem:[%s1392_s28 + $0x130] sm:$0xff]  ;;  %v231_v29 = vld [vmem:[%s1392_s28 + $0x138] sm:$0xff]  ;;  %v232_v33 = vld [vmem:[%s1392_s28 + $0x140] sm:$0xff] }
  0x1d   : > { %1103 = vmatmul.msk.f32.gmra.mxu2 %vm260_vm1, %v225_v5  ;;  %v198_v26 = vld [vmem:[%s1392_s28 + $0x30] sm:$0xff]  ;;  %v199_v30 = vld [vmem:[%s1392_s28 + $0x38] sm:$0xff]  ;;  %v200_v34 = vld [vmem:[%s1392_s28 + $0x40] sm:$0xff] }
  0x1e   : > { %1071 = vmatmul.msk.f32.gmra.mxu0 %vm260_vm1, %v193_v6  ;;  %v214_v27 = vld [vmem:[%s1392_s28 + $0xb0] sm:$0xff]  ;;  %v215_v31 = vld [vmem:[%s1392_s28 + $0xb8] sm:$0xff]  ;;  %v216_v35 = vld [vmem:[%s1392_s28 + $0xc0] sm:$0xff] }
  0x1f   : > { %1087 = vmatmul.msk.f32.gmra.mxu1 %vm260_vm1, %v209_v7  ;;  %v246_v28 = vld [vmem:[%s1392_s28 + $0x1b0] sm:$0xff]  ;;  %v247_v32 = vld [vmem:[%s1392_s28 + $0x1b8] sm:$0xff]  ;;  %v248_v36 = vld [vmem:[%s1392_s28 + $0x1c0] sm:$0xff] }
  0x20   : > { %1119 = vmatmul.msk.f32.gmra.mxu3 %vm260_vm1, %v241_v8  ;;  %v233_v37 = vld [vmem:[%s1392_s28 + $0x148] sm:$0xff]  ;;  %v234_v41 = vld [vmem:[%s1392_s28 + $0x150] sm:$0xff]  ;;  %v235_v45 = vld [vmem:[%s1392_s28 + $0x158] sm:$0xff] }
  0x21   : > { %v201_v38 = vld [vmem:[%s1392_s28 + $0x48] sm:$0xff]  ;;  %v202_v42 = vld [vmem:[%s1392_s28 + $0x50] sm:$0xff]  ;;  %v203_v46 = vld [vmem:[%s1392_s28 + $0x58] sm:$0xff] }
  0x22   : > { %v217_v39 = vld [vmem:[%s1392_s28 + $0xc8] sm:$0xff]  ;;  %v218_v43 = vld [vmem:[%s1392_s28 + $0xd0] sm:$0xff]  ;;  %v219_v47 = vld [vmem:[%s1392_s28 + $0xd8] sm:$0xff] }
  0x23   : > { %v249_v40 = vld [vmem:[%s1392_s28 + $0x1c8] sm:$0xff]  ;;  %v250_v44 = vld [vmem:[%s1392_s28 + $0x1d0] sm:$0xff]  ;;  %v251_v48 = vld [vmem:[%s1392_s28 + $0x1d8] sm:$0xff] }
  0x24   : > { %v236_v49 = vld [vmem:[%s1392_s28 + $0x160] sm:$0xff]  ;;  %v237_v53 = vld [vmem:[%s1392_s28 + $0x168] sm:$0xff]  ;;  %v238_v57 = vld [vmem:[%s1392_s28 + $0x170] sm:$0xff] }
  0x25   : > { %1104 = vmatmul.msk.f32.gmra.mxu2 %vm260_vm1, %v226_v9  ;;  %v204_v50 = vld [vmem:[%s1392_s28 + $0x60] sm:$0xff]  ;;  %v205_v54 = vld [vmem:[%s1392_s28 + $0x68] sm:$0xff]  ;;  %v206_v58 = vld [vmem:[%s1392_s28 + $0x70] sm:$0xff] }
  0x26   : > { %1072 = vmatmul.msk.f32.gmra.mxu0 %vm260_vm1, %v194_v10  ;;  %v220_v51 = vld [vmem:[%s1392_s28 + $0xe0] sm:$0xff]  ;;  %v221_v55 = vld [vmem:[%s1392_s28 + $0xe8] sm:$0xff]  ;;  %v222_v59 = vld [vmem:[%s1392_s28 + $0xf0] sm:$0xff] }
  0x27   : > { %1088 = vmatmul.msk.f32.gmra.mxu1 %vm260_vm1, %v210_v11  ;;  %v252_v52 = vld [vmem:[%s1392_s28 + $0x1e0] sm:$0xff]  ;;  %v253_v56 = vld [vmem:[%s1392_s28 + $0x1e8] sm:$0xff]  ;;  %v254_v60 = vld [vmem:[%s1392_s28 + $0x1f0] sm:$0xff] }
  0x28   : > { %1120 = vmatmul.msk.f32.gmra.mxu3 %vm260_vm1, %v242_v12  ;;  %v239_v61 = vld [vmem:[%s1392_s28 + $0x178] sm:$0xff] }
  0x29   : > { %v207_v62 = vld [vmem:[%s1392_s28 + $0x78] sm:$0xff] }
  0x2a   : > { %v223_v63 = vld [vmem:[%s1392_s28 + $0xf8] sm:$0xff] }
  0x2d   : > { %1105 = vmatmul.msk.f32.gmra.mxu2 %vm260_vm1, %v227_v13 }
  0x2e   : > { %1073 = vmatmul.msk.f32.gmra.mxu0 %vm260_vm1, %v195_v14 }
  0x2f   : > { %1089 = vmatmul.msk.f32.gmra.mxu1 %vm260_vm1, %v211_v15 }
  0x30   : > { %1121 = vmatmul.msk.f32.gmra.mxu3 %vm260_vm1, %v243_v16 }
  0x35   : > { %1106 = vmatmul.msk.f32.gmra.mxu2 %vm260_vm1, %v228_v17 }
  0x36   : > { %1074 = vmatmul.msk.f32.gmra.mxu0 %vm260_vm1, %v196_v18 }
  0x37   : > { %1090 = vmatmul.msk.f32.gmra.mxu1 %vm260_vm1, %v212_v19 }
  0x38   : > { %1122 = vmatmul.msk.f32.gmra.mxu3 %vm260_vm1, %v244_v20 }
  0x3d   : > { %1107 = vmatmul.msk.f32.gmra.mxu2 %vm260_vm1, %v229_v21 }
  0x3e   : > { %1075 = vmatmul.msk.f32.gmra.mxu0 %vm260_vm1, %v197_v22 }
  0x3f   : > { %1091 = vmatmul.msk.f32.gmra.mxu1 %vm260_vm1, %v213_v23 }
  0x40   : > { %1123 = vmatmul.msk.f32.gmra.mxu3 %vm260_vm1, %v245_v24 }
  0x45   : > { %1108 = vmatmul.msk.f32.gmra.mxu2 %vm260_vm1, %v230_v25 }
  0x46   : > { %1076 = vmatmul.msk.f32.gmra.mxu0 %vm260_vm1, %v198_v26 }
  0x47   : > { %1092 = vmatmul.msk.f32.gmra.mxu1 %vm260_vm1, %v214_v27 }
  0x48   : > { %1124 = vmatmul.msk.f32.gmra.mxu3 %vm260_vm1, %v246_v28 }
  0x4d   : > { %1109 = vmatmul.msk.f32.gmra.mxu2 %vm260_vm1, %v231_v29 }
  0x4e   : > { %1077 = vmatmul.msk.f32.gmra.mxu0 %vm260_vm1, %v199_v30 }
  0x4f   : > { %1093 = vmatmul.msk.f32.gmra.mxu1 %vm260_vm1, %v215_v31 }
  0x50   : > { %1125 = vmatmul.msk.f32.gmra.mxu3 %vm260_vm1, %v247_v32 }
  0x55   : > { %1110 = vmatmul.msk.f32.gmra.mxu2 %vm260_vm1, %v232_v33 }
  0x56   : > { %1078 = vmatmul.msk.f32.gmra.mxu0 %vm260_vm1, %v200_v34 }
  0x57   : > { %1094 = vmatmul.msk.f32.gmra.mxu1 %vm260_vm1, %v216_v35 }
  0x58   : > { %1126 = vmatmul.msk.f32.gmra.mxu3 %vm260_vm1, %v248_v36 }
  0x5d   : > { %1111 = vmatmul.msk.f32.gmra.mxu2 %vm260_vm1, %v233_v37 }
  0x5e   : > { %1079 = vmatmul.msk.f32.gmra.mxu0 %vm260_vm1, %v201_v38 }
  0x5f   : > { %1095 = vmatmul.msk.f32.gmra.mxu1 %vm260_vm1, %v217_v39 }
  0x60   : > { %1127 = vmatmul.msk.f32.gmra.mxu3 %vm260_vm1, %v249_v40 }
  0x65   : > { %1112 = vmatmul.msk.f32.gmra.mxu2 %vm260_vm1, %v234_v41 }
  0x66   : > { %1080 = vmatmul.msk.f32.gmra.mxu0 %vm260_vm1, %v202_v42 }
  0x67   : > { %1096 = vmatmul.msk.f32.gmra.mxu1 %vm260_vm1, %v218_v43 }
  0x68   : > { %1128 = vmatmul.msk.f32.gmra.mxu3 %vm260_vm1, %v250_v44 }
  0x6d   : > { %1113 = vmatmul.msk.f32.gmra.mxu2 %vm260_vm1, %v235_v45 }
  0x6e   : > { %1081 = vmatmul.msk.f32.gmra.mxu0 %vm260_vm1, %v203_v46 }
  0x6f   : > { %1097 = vmatmul.msk.f32.gmra.mxu1 %vm260_vm1, %v219_v47 }
  0x70   : > { %1129 = vmatmul.msk.f32.gmra.mxu3 %vm260_vm1, %v251_v48 }
  0x75   : > { %1114 = vmatmul.msk.f32.gmra.mxu2 %vm260_vm1, %v236_v49 }
  0x76   : > { %1082 = vmatmul.msk.f32.gmra.mxu0 %vm260_vm1, %v204_v50 }
  0x77   : > { %1098 = vmatmul.msk.f32.gmra.mxu1 %vm260_vm1, %v220_v51 }
  0x78   : > { %1130 = vmatmul.msk.f32.gmra.mxu3 %vm260_vm1, %v252_v52 }
  0x7d   : > { %1115 = vmatmul.msk.f32.gmra.mxu2 %vm260_vm1, %v237_v53 }
  0x7e   : > { %1083 = vmatmul.msk.f32.gmra.mxu0 %vm260_vm1, %v205_v54 }
  0x7f   : > { %1099 = vmatmul.msk.f32.gmra.mxu1 %vm260_vm1, %v221_v55 }
  0x80   : > { %1131 = vmatmul.msk.f32.gmra.mxu3 %vm260_vm1, %v253_v56 }
  0x85   : > { %1116 = vmatmul.msk.f32.gmra.mxu2 %vm260_vm1, %v238_v57 }
  0x86   : > { %1084 = vmatmul.msk.f32.gmra.mxu0 %vm260_vm1, %v206_v58 }
  0x87   : > { %1100 = vmatmul.msk.f32.gmra.mxu1 %vm260_vm1, %v222_v59 }
  0x88   : > { %1132 = vmatmul.msk.f32.gmra.mxu3 %vm260_vm1, %v254_v60 }
  0x8d   : > { %1117 = vmatmul.msk.f32.gmra.mxu2 %vm260_vm1, %v239_v61 }
  0x8e   : > { %1085 = vmatmul.msk.f32.gmra.mxu0 %vm260_vm1, %v207_v62 }
  0x8f   : > { %1101 = vmatmul.msk.f32.gmra.mxu1 %vm260_vm1, %v223_v63 }
  0x93   : > { %v471_v1 = vpop.f32.mrf.mxu0 }
  0x94   : > { %v472_v2 = vadd.f32 %v1524_v0, %v471_v1  ;;  %v519_v3 = vpop.f32.mrf.mxu1 }
  0x95   : > { %v520_v4 = vadd.f32 %v1524_v0, %v519_v3 }
  0x96   : > { %661 = vst.msk [vmem:[%s1528_s6] sm:$0xff] %vm660_vm2, %v472_v2 }
  0x97   : > { %677 = vst.msk [vmem:[%s1528_s6 + $0x80] sm:$0xff] %vm660_vm2, %v520_v4 }
  0x98   : > { %v567_v5 = vpop.f32.mrf.mxu2 }
  0x99   : > { %v568_v6 = vadd.f32 %v1524_v0, %v567_v5 }
  0x9b   : > { %v615_v7 = vpop.f32.mrf.mxu3  ;;  %v474_v8 = vpop.f32.mrf.mxu0  ;;  %693 = vst.msk [vmem:[%s1528_s6 + $0x100] sm:$0xff] %vm660_vm2, %v568_v6 }
  0x9c   : > { %v616_v9 = vadd.f32 %v1524_v0, %v615_v7  ;;  %v475_v10 = vadd.f32 %v1524_v0, %v474_v8  ;;  %v522_v11 = vpop.f32.mrf.mxu1 }
  0x9d   : > { %v523_v12 = vadd.f32 %v1524_v0, %v522_v11 }
  0x9e   : > { %709 = vst.msk [vmem:[%s1528_s6 + $0x180] sm:$0xff] %vm660_vm2, %v616_v9 }
  0x9f   : > { %662 = vst.msk [vmem:[%s1528_s6 + $0x8] sm:$0xff] %vm660_vm2, %v475_v10 }
  0xa0   : > { %678 = vst.msk [vmem:[%s1528_s6 + $0x88] sm:$0xff] %vm660_vm2, %v523_v12  ;;  %v570_v13 = vpop.f32.mrf.mxu2 }
  0xa1   : > { %v571_v14 = vadd.f32 %v1524_v0, %v570_v13 }
  0xa3   : > { %v618_v15 = vpop.f32.mrf.mxu3  ;;  %v477_v16 = vpop.f32.mrf.mxu0  ;;  %694 = vst.msk [vmem:[%s1528_s6 + $0x108] sm:$0xff] %vm660_vm2, %v571_v14 }
  0xa4   : > { %v619_v17 = vadd.f32 %v1524_v0, %v618_v15  ;;  %v478_v18 = vadd.f32 %v1524_v0, %v477_v16  ;;  %v525_v19 = vpop.f32.mrf.mxu1 }
  0xa5   : > { %v526_v20 = vadd.f32 %v1524_v0, %v525_v19 }
  0xa6   : > { %710 = vst.msk [vmem:[%s1528_s6 + $0x188] sm:$0xff] %vm660_vm2, %v619_v17 }
  0xa7   : > { %663 = vst.msk [vmem:[%s1528_s6 + $0x10] sm:$0xff] %vm660_vm2, %v478_v18 }
  0xa8   : > { %679 = vst.msk [vmem:[%s1528_s6 + $0x90] sm:$0xff] %vm660_vm2, %v526_v20  ;;  %v573_v21 = vpop.f32.mrf.mxu2 }
  0xa9   : > { %v574_v22 = vadd.f32 %v1524_v0, %v573_v21 }
  0xab   : > { %v621_v23 = vpop.f32.mrf.mxu3  ;;  %v480_v24 = vpop.f32.mrf.mxu0  ;;  %695 = vst.msk [vmem:[%s1528_s6 + $0x110] sm:$0xff] %vm660_vm2, %v574_v22 }
  0xac   : > { %v622_v25 = vadd.f32 %v1524_v0, %v621_v23  ;;  %v481_v26 = vadd.f32 %v1524_v0, %v480_v24  ;;  %v528_v27 = vpop.f32.mrf.mxu1 }
  0xad   : > { %v529_v28 = vadd.f32 %v1524_v0, %v528_v27 }
  0xae   : > { %711 = vst.msk [vmem:[%s1528_s6 + $0x190] sm:$0xff] %vm660_vm2, %v622_v25 }
  0xaf   : > { %664 = vst.msk [vmem:[%s1528_s6 + $0x18] sm:$0xff] %vm660_vm2, %v481_v26 }
  0xb0   : > { %680 = vst.msk [vmem:[%s1528_s6 + $0x98] sm:$0xff] %vm660_vm2, %v529_v28  ;;  %v576_v29 = vpop.f32.mrf.mxu2 }
  0xb1   : > { %v577_v30 = vadd.f32 %v1524_v0, %v576_v29 }
  0xb3   : > { %v624_v31 = vpop.f32.mrf.mxu3  ;;  %v483_v32 = vpop.f32.mrf.mxu0  ;;  %696 = vst.msk [vmem:[%s1528_s6 + $0x118] sm:$0xff] %vm660_vm2, %v577_v30 }
  0xb4   : > { %v625_v33 = vadd.f32 %v1524_v0, %v624_v31  ;;  %v484_v34 = vadd.f32 %v1524_v0, %v483_v32  ;;  %v531_v35 = vpop.f32.mrf.mxu1 }
  0xb5   : > { %v532_v36 = vadd.f32 %v1524_v0, %v531_v35 }
  0xb6   : > { %712 = vst.msk [vmem:[%s1528_s6 + $0x198] sm:$0xff] %vm660_vm2, %v625_v33 }
  0xb7   : > { %665 = vst.msk [vmem:[%s1528_s6 + $0x20] sm:$0xff] %vm660_vm2, %v484_v34 }
  0xb8   : > { %681 = vst.msk [vmem:[%s1528_s6 + $0xa0] sm:$0xff] %vm660_vm2, %v532_v36  ;;  %v579_v37 = vpop.f32.mrf.mxu2 }
  0xb9   : > { %v580_v38 = vadd.f32 %v1524_v0, %v579_v37 }
  0xbb   : > { %v627_v39 = vpop.f32.mrf.mxu3  ;;  %v486_v40 = vpop.f32.mrf.mxu0  ;;  %697 = vst.msk [vmem:[%s1528_s6 + $0x120] sm:$0xff] %vm660_vm2, %v580_v38 }
  0xbc   : > { %v628_v41 = vadd.f32 %v1524_v0, %v627_v39  ;;  %v487_v42 = vadd.f32 %v1524_v0, %v486_v40  ;;  %v534_v43 = vpop.f32.mrf.mxu1 }
  0xbd   : > { %v535_v44 = vadd.f32 %v1524_v0, %v534_v43 }
  0xbe   : > { %713 = vst.msk [vmem:[%s1528_s6 + $0x1a0] sm:$0xff] %vm660_vm2, %v628_v41 }
  0xbf   : > { %666 = vst.msk [vmem:[%s1528_s6 + $0x28] sm:$0xff] %vm660_vm2, %v487_v42 }
  0xc0   : > { %682 = vst.msk [vmem:[%s1528_s6 + $0xa8] sm:$0xff] %vm660_vm2, %v535_v44  ;;  %v582_v45 = vpop.f32.mrf.mxu2 }
  0xc1   : > { %v583_v46 = vadd.f32 %v1524_v0, %v582_v45 }
  0xc3   : > { %v630_v47 = vpop.f32.mrf.mxu3  ;;  %v489_v48 = vpop.f32.mrf.mxu0  ;;  %698 = vst.msk [vmem:[%s1528_s6 + $0x128] sm:$0xff] %vm660_vm2, %v583_v46 }
  0xc4   : > { %v631_v49 = vadd.f32 %v1524_v0, %v630_v47  ;;  %v490_v50 = vadd.f32 %v1524_v0, %v489_v48  ;;  %v537_v51 = vpop.f32.mrf.mxu1 }
  0xc5   : > { %v538_v52 = vadd.f32 %v1524_v0, %v537_v51 }
  0xc6   : > { %714 = vst.msk [vmem:[%s1528_s6 + $0x1a8] sm:$0xff] %vm660_vm2, %v631_v49 }
  0xc7   : > { %667 = vst.msk [vmem:[%s1528_s6 + $0x30] sm:$0xff] %vm660_vm2, %v490_v50 }
  0xc8   : > { %683 = vst.msk [vmem:[%s1528_s6 + $0xb0] sm:$0xff] %vm660_vm2, %v538_v52  ;;  %v585_v53 = vpop.f32.mrf.mxu2 }
  0xc9   : > { %v586_v54 = vadd.f32 %v1524_v0, %v585_v53 }
  0xcb   : > { %v633_v55 = vpop.f32.mrf.mxu3  ;;  %v492_v56 = vpop.f32.mrf.mxu0  ;;  %699 = vst.msk [vmem:[%s1528_s6 + $0x130] sm:$0xff] %vm660_vm2, %v586_v54 }
  0xcc   : > { %v634_v57 = vadd.f32 %v1524_v0, %v633_v55  ;;  %v493_v58 = vadd.f32 %v1524_v0, %v492_v56  ;;  %v540_v59 = vpop.f32.mrf.mxu1 }
  0xcd   : > { %v541_v60 = vadd.f32 %v1524_v0, %v540_v59 }
  0xce   : > { %715 = vst.msk [vmem:[%s1528_s6 + $0x1b0] sm:$0xff] %vm660_vm2, %v634_v57 }
  0xcf   : > { %668 = vst.msk [vmem:[%s1528_s6 + $0x38] sm:$0xff] %vm660_vm2, %v493_v58 }
  0xd0   : > { %684 = vst.msk [vmem:[%s1528_s6 + $0xb8] sm:$0xff] %vm660_vm2, %v541_v60  ;;  %v588_v61 = vpop.f32.mrf.mxu2 }
  0xd1   : > { %v589_v62 = vadd.f32 %v1524_v0, %v588_v61 }
  0xd3   : > { %v636_v63 = vpop.f32.mrf.mxu3  ;;  %v495_v1 = vpop.f32.mrf.mxu0  ;;  %700 = vst.msk [vmem:[%s1528_s6 + $0x138] sm:$0xff] %vm660_vm2, %v589_v62 }
  0xd4   : > { %v637_v2 = vadd.f32 %v1524_v0, %v636_v63  ;;  %v496_v3 = vadd.f32 %v1524_v0, %v495_v1  ;;  %v543_v4 = vpop.f32.mrf.mxu1 }
  0xd5   : > { %v544_v5 = vadd.f32 %v1524_v0, %v543_v4 }
  0xd6   : > { %716 = vst.msk [vmem:[%s1528_s6 + $0x1b8] sm:$0xff] %vm660_vm2, %v637_v2 }
  0xd7   : > { %669 = vst.msk [vmem:[%s1528_s6 + $0x40] sm:$0xff] %vm660_vm2, %v496_v3 }
  0xd8   : > { %685 = vst.msk [vmem:[%s1528_s6 + $0xc0] sm:$0xff] %vm660_vm2, %v544_v5  ;;  %v591_v6 = vpop.f32.mrf.mxu2 }
  0xd9   : > { %v592_v7 = vadd.f32 %v1524_v0, %v591_v6 }
  0xdb   : > { %v639_v8 = vpop.f32.mrf.mxu3  ;;  %v498_v9 = vpop.f32.mrf.mxu0  ;;  %701 = vst.msk [vmem:[%s1528_s6 + $0x140] sm:$0xff] %vm660_vm2, %v592_v7 }
  0xdc   : > { %v640_v10 = vadd.f32 %v1524_v0, %v639_v8  ;;  %v499_v11 = vadd.f32 %v1524_v0, %v498_v9  ;;  %v546_v12 = vpop.f32.mrf.mxu1 }
  0xdd   : > { %v547_v13 = vadd.f32 %v1524_v0, %v546_v12 }
  0xde   : > { %717 = vst.msk [vmem:[%s1528_s6 + $0x1c0] sm:$0xff] %vm660_vm2, %v640_v10 }
  0xdf   : > { %670 = vst.msk [vmem:[%s1528_s6 + $0x48] sm:$0xff] %vm660_vm2, %v499_v11 }
  0xe0   : > { %686 = vst.msk [vmem:[%s1528_s6 + $0xc8] sm:$0xff] %vm660_vm2, %v547_v13  ;;  %v594_v14 = vpop.f32.mrf.mxu2 }
  0xe1   : > { %v595_v15 = vadd.f32 %v1524_v0, %v594_v14 }
  0xe3   : > { %v642_v16 = vpop.f32.mrf.mxu3  ;;  %v501_v17 = vpop.f32.mrf.mxu0  ;;  %702 = vst.msk [vmem:[%s1528_s6 + $0x148] sm:$0xff] %vm660_vm2, %v595_v15 }
  0xe4   : > { %v643_v18 = vadd.f32 %v1524_v0, %v642_v16  ;;  %v502_v19 = vadd.f32 %v1524_v0, %v501_v17  ;;  %v549_v20 = vpop.f32.mrf.mxu1 }
  0xe5   : > { %v550_v21 = vadd.f32 %v1524_v0, %v549_v20 }
  0xe6   : > { %718 = vst.msk [vmem:[%s1528_s6 + $0x1c8] sm:$0xff] %vm660_vm2, %v643_v18 }
  0xe7   : > { %671 = vst.msk [vmem:[%s1528_s6 + $0x50] sm:$0xff] %vm660_vm2, %v502_v19 }
  0xe8   : > { %687 = vst.msk [vmem:[%s1528_s6 + $0xd0] sm:$0xff] %vm660_vm2, %v550_v21  ;;  %v597_v22 = vpop.f32.mrf.mxu2 }
  0xe9   : > { %v598_v23 = vadd.f32 %v1524_v0, %v597_v22 }
  0xeb   : > { %v645_v24 = vpop.f32.mrf.mxu3  ;;  %v504_v25 = vpop.f32.mrf.mxu0  ;;  %703 = vst.msk [vmem:[%s1528_s6 + $0x150] sm:$0xff] %vm660_vm2, %v598_v23 }
  0xec   : > { %v646_v26 = vadd.f32 %v1524_v0, %v645_v24  ;;  %v505_v27 = vadd.f32 %v1524_v0, %v504_v25  ;;  %v552_v28 = vpop.f32.mrf.mxu1 }
  0xed   : > { %v553_v29 = vadd.f32 %v1524_v0, %v552_v28 }
  0xee   : > { %719 = vst.msk [vmem:[%s1528_s6 + $0x1d0] sm:$0xff] %vm660_vm2, %v646_v26 }
  0xef   : > { %672 = vst.msk [vmem:[%s1528_s6 + $0x58] sm:$0xff] %vm660_vm2, %v505_v27 }
  0xf0   : > { %688 = vst.msk [vmem:[%s1528_s6 + $0xd8] sm:$0xff] %vm660_vm2, %v553_v29  ;;  %v600_v30 = vpop.f32.mrf.mxu2 }
  0xf1   : > { %v601_v31 = vadd.f32 %v1524_v0, %v600_v30 }
  0xf3   : > { %v648_v32 = vpop.f32.mrf.mxu3  ;;  %v507_v33 = vpop.f32.mrf.mxu0  ;;  %704 = vst.msk [vmem:[%s1528_s6 + $0x158] sm:$0xff] %vm660_vm2, %v601_v31 }
  0xf4   : > { %v649_v34 = vadd.f32 %v1524_v0, %v648_v32  ;;  %v508_v35 = vadd.f32 %v1524_v0, %v507_v33  ;;  %v555_v36 = vpop.f32.mrf.mxu1 }
  0xf5   : > { %v556_v37 = vadd.f32 %v1524_v0, %v555_v36 }
  0xf6   : > { %720 = vst.msk [vmem:[%s1528_s6 + $0x1d8] sm:$0xff] %vm660_vm2, %v649_v34 }
  0xf7   : > { %673 = vst.msk [vmem:[%s1528_s6 + $0x60] sm:$0xff] %vm660_vm2, %v508_v35 }
  0xf8   : > { %689 = vst.msk [vmem:[%s1528_s6 + $0xe0] sm:$0xff] %vm660_vm2, %v556_v37  ;;  %v603_v38 = vpop.f32.mrf.mxu2 }
  0xf9   : > { %v604_v39 = vadd.f32 %v1524_v0, %v603_v38 }
  0xfb   : > { %v651_v40 = vpop.f32.mrf.mxu3  ;;  %v510_v41 = vpop.f32.mrf.mxu0  ;;  %705 = vst.msk [vmem:[%s1528_s6 + $0x160] sm:$0xff] %vm660_vm2, %v604_v39 }
  0xfc   : > { %v652_v42 = vadd.f32 %v1524_v0, %v651_v40  ;;  %v511_v43 = vadd.f32 %v1524_v0, %v510_v41  ;;  %v558_v44 = vpop.f32.mrf.mxu1 }
  0xfd   : > { %v559_v45 = vadd.f32 %v1524_v0, %v558_v44 }
  0xfe   : > { %721 = vst.msk [vmem:[%s1528_s6 + $0x1e0] sm:$0xff] %vm660_vm2, %v652_v42 }
  0xff   : > { %674 = vst.msk [vmem:[%s1528_s6 + $0x68] sm:$0xff] %vm660_vm2, %v511_v43 }
 0x100   : > { %690 = vst.msk [vmem:[%s1528_s6 + $0xe8] sm:$0xff] %vm660_vm2, %v559_v45  ;;  %v606_v46 = vpop.f32.mrf.mxu2 }
 0x101   : > { %v607_v47 = vadd.f32 %v1524_v0, %v606_v46 }
 0x103   : > { %v654_v48 = vpop.f32.mrf.mxu3  ;;  %v513_v49 = vpop.f32.mrf.mxu0  ;;  %706 = vst.msk [vmem:[%s1528_s6 + $0x168] sm:$0xff] %vm660_vm2, %v607_v47 }
 0x104   : > { %v655_v50 = vadd.f32 %v1524_v0, %v654_v48  ;;  %v514_v51 = vadd.f32 %v1524_v0, %v513_v49  ;;  %v561_v52 = vpop.f32.mrf.mxu1 }
 0x105   : > { %v562_v53 = vadd.f32 %v1524_v0, %v561_v52 }
 0x106   : > { %722 = vst.msk [vmem:[%s1528_s6 + $0x1e8] sm:$0xff] %vm660_vm2, %v655_v50 }
 0x107   : > { %675 = vst.msk [vmem:[%s1528_s6 + $0x70] sm:$0xff] %vm660_vm2, %v514_v51 }
 0x108   : > { %691 = vst.msk [vmem:[%s1528_s6 + $0xf0] sm:$0xff] %vm660_vm2, %v562_v53  ;;  %v609_v54 = vpop.f32.mrf.mxu2 }
 0x109   : > { %v610_v55 = vadd.f32 %v1524_v0, %v609_v54 }
 0x10b   : > { %v657_v56 = vpop.f32.mrf.mxu3  ;;  %v516_v57 = vpop.f32.mrf.mxu0  ;;  %707 = vst.msk [vmem:[%s1528_s6 + $0x170] sm:$0xff] %vm660_vm2, %v610_v55 }
 0x10c   : > { %v658_v58 = vadd.f32 %v1524_v0, %v657_v56  ;;  %v517_v59 = vadd.f32 %v1524_v0, %v516_v57  ;;  %v564_v60 = vpop.f32.mrf.mxu1 }
 0x10d   : > { %v565_v61 = vadd.f32 %v1524_v0, %v564_v60 }
 0x10e   : > { %723 = vst.msk [vmem:[%s1528_s6 + $0x1f0] sm:$0xff] %vm660_vm2, %v658_v58 }
 0x10f   : > { %676 = vst.msk [vmem:[%s1528_s6 + $0x78] sm:$0xff] %vm660_vm2, %v517_v59  ;;  %730 = sbr.rel (!%p1377_p4) target bundleno = 340 (0x154), region = 36 }
 0x110   : > { %692 = vst.msk [vmem:[%s1528_s6 + $0xf8] sm:$0xff] %vm660_vm2, %v565_v61  ;;  %v612_v62 = vpop.f32.mrf.mxu2 }
 0x111   : > { %v613_v63 = vadd.f32 %v1524_v0, %v612_v62 }
 0x113   : > { %708 = vst.msk [vmem:[%s1528_s6 + $0x178] sm:$0xff] %vm660_vm2, %v613_v63 }
 0x114   : > { %s1873_s7 = smov (!%p733_p8, %s732_s7), 63 }
 0x115   : > { %s1133_s12 = sshll.u32 %s1873_s7, 3 }
 0x116   : > { %p1136_p9 = scmp.eq.s32.totalorder %s1133_s12, 0 }
 0x117   : > { %s1730_s14 = sshrl.u32 (!%p1136_p9), %s1873_s7, 5 }
 0x118   : > { %741 = sbr.rel (%p1136_p9) target bundleno = 340 (0x154), region = 40  ;;  %p1137_p10 = scmp.le.s32.totalorder (!%p1136_p9), %s1730_s14, 0 }
 0x11d   : > { %1020 = sbr.rel (%p1137_p10) target bundleno = 323 (0x143), region = 116  ;;  %s1864_s15 = smov (!%p1137_p10), %s1724_s11 }
 0x11e   : > { %s1865_s17 = smov (!%p1137_p10), %s1528_s6  ;;  %s1739_s18 = smov (!%p1137_p10), 0  }
 0x11f   : > { %s1741_s20 = smov (!%p1137_p10), 0  }
 0x122 LB: >> { %v866_v0 = vld [vmem:[%s1306_s17] sm:$0xff]  ;;  %v868_v1 = vld [vmem:[%s1306_s17 + $0x8] sm:$0xff]  ;;  %v870_v2 = vld [vmem:[%s1306_s17 + $0x10] sm:$0xff]  ;;  %s930_s21 = sadd.s32 1, %s1310_s18  ;;  %s860_s20 = sadd.s32 1, %s1314_s20   ;;  %s1314_s20 = sphi %s1741_s20, %s860_s20   ;;  %s1310_s18 = sphi %s1739_s18, %s1868_s18   ;;  %s1306_s17 = sphi %s1865_s17, %s1867_s17   ;;  %s1302_s15 = sphi %s1864_s15, %s1866_s15  }
 0x123   : >> { %867 = vst [vmem:[%s1302_s15] sm:$0xff] %v866_v0  ;;  %v872_v3 = vld [vmem:[%s1306_s17 + $0x18] sm:$0xff]  ;;  %p931_p11 = scmp.ge.s32.totalorder %s930_s21, %s1730_s14  ;;  %v874_v4 = vld [vmem:[%s1306_s17 + $0x20] sm:$0xff]  ;;  %v876_v5 = vld [vmem:[%s1306_s17 + $0x28] sm:$0xff]  ;;  %p859_p12 = scmp.ge.s32.totalorder %s860_s20, %s1730_s14 }
 0x124   : >> { %869 = vst [vmem:[%s1302_s15 + $0x8] sm:$0xff] %v868_v1  ;;  %v878_v6 = vld [vmem:[%s1306_s17 + $0x30] sm:$0xff]  ;;  %v880_v7 = vld [vmem:[%s1306_s17 + $0x38] sm:$0xff]  ;;  %v882_v8 = vld [vmem:[%s1306_s17 + $0x40] sm:$0xff] }
 0x125   : >> { %871 = vst [vmem:[%s1302_s15 + $0x10] sm:$0xff] %v870_v2  ;;  %s1875_s21 = smov (%p931_p11, %s930_s21), 0  ;;  %v884_v9 = vld [vmem:[%s1306_s17 + $0x48] sm:$0xff]  ;;  %v886_v10 = vld [vmem:[%s1306_s17 + $0x50] sm:$0xff]  ;;  %v888_v11 = vld [vmem:[%s1306_s17 + $0x58] sm:$0xff] }
 0x126   : >> { %873 = vst [vmem:[%s1302_s15 + $0x18] sm:$0xff] %v872_v3  ;;  %s1138_s22 = sshll.u32 %s1875_s21, 8  ;;  %v890_v12 = vld [vmem:[%s1306_s17 + $0x60] sm:$0xff]  ;;  %v892_v13 = vld [vmem:[%s1306_s17 + $0x68] sm:$0xff]  ;;  %v894_v14 = vld [vmem:[%s1306_s17 + $0x70] sm:$0xff]  ;;  %s1868_s18 = smov %s1875_s21 }
 0x127   : >> { %875 = vst [vmem:[%s1302_s15 + $0x20] sm:$0xff] %v874_v4  ;;  %s1773_s23 = scalar_lea.vmem %s1528_s6, %s1138_s22 [#allocation2]   ;;  %s1776_s24 = scalar_lea.vmem %s1724_s11, %s1138_s22   ;;  %v896_v15 = vld [vmem:[%s1306_s17 + $0x78] sm:$0xff]  ;;  %v898_v16 = vld [vmem:[%s1306_s17 + $0x80] sm:$0xff]  ;;  %v900_v17 = vld [vmem:[%s1306_s17 + $0x88] sm:$0xff] }
 0x128   : >> { %877 = vst [vmem:[%s1302_s15 + $0x28] sm:$0xff] %v876_v5  ;;  %v902_v18 = vld [vmem:[%s1306_s17 + $0x90] sm:$0xff]  ;;  %v904_v19 = vld [vmem:[%s1306_s17 + $0x98] sm:$0xff]  ;;  %v906_v20 = vld [vmem:[%s1306_s17 + $0xa0] sm:$0xff] }
 0x129   : >> { %879 = vst [vmem:[%s1302_s15 + $0x30] sm:$0xff] %v878_v6  ;;  %v908_v21 = vld [vmem:[%s1306_s17 + $0xa8] sm:$0xff]  ;;  %v910_v22 = vld [vmem:[%s1306_s17 + $0xb0] sm:$0xff]  ;;  %v912_v23 = vld [vmem:[%s1306_s17 + $0xb8] sm:$0xff] }
 0x12a   : >> { %881 = vst [vmem:[%s1302_s15 + $0x38] sm:$0xff] %v880_v7  ;;  %v914_v24 = vld [vmem:[%s1306_s17 + $0xc0] sm:$0xff]  ;;  %v916_v25 = vld [vmem:[%s1306_s17 + $0xc8] sm:$0xff]  ;;  %v918_v26 = vld [vmem:[%s1306_s17 + $0xd0] sm:$0xff] }
 0x12b   : >> { %883 = vst [vmem:[%s1302_s15 + $0x40] sm:$0xff] %v882_v8  ;;  %v920_v27 = vld [vmem:[%s1306_s17 + $0xd8] sm:$0xff]  ;;  %v922_v28 = vld [vmem:[%s1306_s17 + $0xe0] sm:$0xff]  ;;  %v924_v29 = vld [vmem:[%s1306_s17 + $0xe8] sm:$0xff] }
 0x12c   : >> { %885 = vst [vmem:[%s1302_s15 + $0x48] sm:$0xff] %v884_v9  ;;  %v926_v30 = vld [vmem:[%s1306_s17 + $0xf0] sm:$0xff]  ;;  %v928_v31 = vld [vmem:[%s1306_s17 + $0xf8] sm:$0xff]  ;;  %s1867_s17 = smov %s1773_s23 }
 0x12d   : >> { %887 = vst [vmem:[%s1302_s15 + $0x50] sm:$0xff] %v886_v10 }
 0x12e   : >> { %889 = vst [vmem:[%s1302_s15 + $0x58] sm:$0xff] %v888_v11 }
 0x12f   : >> { %891 = vst [vmem:[%s1302_s15 + $0x60] sm:$0xff] %v890_v12 }
 0x130   : >> { %893 = vst [vmem:[%s1302_s15 + $0x68] sm:$0xff] %v892_v13 }
 0x131   : >> { %895 = vst [vmem:[%s1302_s15 + $0x70] sm:$0xff] %v894_v14 }
 0x132   : >> { %897 = vst [vmem:[%s1302_s15 + $0x78] sm:$0xff] %v896_v15 }
 0x133   : >> { %899 = vst [vmem:[%s1302_s15 + $0x80] sm:$0xff] %v898_v16 }
 0x134   : >> { %901 = vst [vmem:[%s1302_s15 + $0x88] sm:$0xff] %v900_v17 }
 0x135   : >> { %903 = vst [vmem:[%s1302_s15 + $0x90] sm:$0xff] %v902_v18 }
 0x136   : >> { %905 = vst [vmem:[%s1302_s15 + $0x98] sm:$0xff] %v904_v19 }
 0x137   : >> { %907 = vst [vmem:[%s1302_s15 + $0xa0] sm:$0xff] %v906_v20 }
 0x138   : >> { %909 = vst [vmem:[%s1302_s15 + $0xa8] sm:$0xff] %v908_v21 }
 0x139   : >> { %911 = vst [vmem:[%s1302_s15 + $0xb0] sm:$0xff] %v910_v22 }
 0x13a   : >> { %913 = vst [vmem:[%s1302_s15 + $0xb8] sm:$0xff] %v912_v23 }
 0x13b   : >> { %915 = vst [vmem:[%s1302_s15 + $0xc0] sm:$0xff] %v914_v24 }
 0x13c   : >> { %917 = vst [vmem:[%s1302_s15 + $0xc8] sm:$0xff] %v916_v25 }
 0x13d   : >> { %919 = vst [vmem:[%s1302_s15 + $0xd0] sm:$0xff] %v918_v26 }
 0x13e   : >> { %921 = vst [vmem:[%s1302_s15 + $0xd8] sm:$0xff] %v920_v27  ;;  %862 = sbr.rel (!%p859_p12) target bundleno = 290 (0x122), region = 122 }
 0x13f   : >> { %923 = vst [vmem:[%s1302_s15 + $0xe0] sm:$0xff] %v922_v28 }
 0x140   : >> { %925 = vst [vmem:[%s1302_s15 + $0xe8] sm:$0xff] %v924_v29 }
 0x141   : >> { %927 = vst [vmem:[%s1302_s15 + $0xf0] sm:$0xff] %v926_v30 }
 0x142   : >> { %929 = vst [vmem:[%s1302_s15 + $0xf8] sm:$0xff] %v928_v31  ;;  %s1866_s15 = smov %s1776_s24 }
 0x143 PF: > { %s1841_s25 = sand.u32 31, %s1873_s7   ;;  %s1149_s26 = sshll.u32 %s1730_s14, 8 }
 0x144   : > { %s941_s27 = scalar_lea.vmem %s1528_s6, %s1149_s26 [#allocation2]   ;;  %s943_s28 = scalar_lea.vmem %s1724_s11, %s1149_s26  }
 0x145   : > { %p1143_p13 = scmp.le.s32.totalorder %s1841_s25, 0 }
 0x146   : > { %s1316_s29 = smov (!%p1143_p13), %s943_s28   ;;  %s1320_s30 = smov (!%p1143_p13), %s941_s27  }
 0x147   : > { %1034 = sbr.rel (%p1143_p13) target bundleno = 340 (0x154), region = 127  ;;  %s1324_s4 = smov (!%p1143_p13), 0  }
 0x148   : > { %s1328_s5 = smov (!%p1143_p13), 0  }
 0x14c LB: >> { %v953_v32 = vld [vmem:[%s1322_s30] sm:$0xff]  ;;  %s955_s7 = sadd.s32 1, %s1326_s4  ;;  %s947_s5 = sadd.s32 1, %s1330_s5   ;;  %s1330_s5 = sphi %s1328_s5, %s947_s5   ;;  %s1326_s4 = sphi %s1324_s4, %s1325_s4   ;;  %s1322_s30 = sphi %s1320_s30, %s960_s30   ;;  %s1318_s29 = sphi %s1316_s29, %s961_s29  }
 0x14d   : >> { %954 = vst [vmem:[%s1318_s29] sm:$0xff] %v953_v32  ;;  %p956_p0 = scmp.ge.s32.totalorder %s955_s7, %s1841_s25  ;;  %p946_p1 = scmp.ge.s32.totalorder %s947_s5, %s1841_s25 }
 0x14f   : >> { %s1877_s7 = smov (%p956_p0, %s955_s7), 0  ;;  %949 = sbr.rel (!%p946_p1) target bundleno = 332 (0x14c), region = 133 }
 0x150   : >> { %s1144_s6 = sshll.u32 %s1877_s7, 3  ;;  %s1325_s4 = smov %s1877_s7  }
 0x151   : >> { %s960_s30 = scalar_lea.vmem %s941_s27, %s1144_s6 [#allocation2]   ;;  %s961_s29 = scalar_lea.vmem %s943_s28, %s1144_s6  }
 0x154 PF: > { %p10_p2 = scmp.ge.s32.totalorder %s1367_s16, 4   ;;  %s1869_s12 = smov %s1294_s13 }
 0x155   : > { %s1870_s13 = smov %s1375_s19  ;;  %s1871_s14 = smov %s1367_s16 }
 0x156   :  { %12 = sbr.rel (!%p10_p2) target bundleno = 2 (0x2), region = 144 }

</bundles_post_ra>
